<compile_context>
chip_gen: v7x
topology: tpu7x:2x2x1
jax: 0.10.0
libtpu: 0.0.40
codegen_flags: <defaults>
</compile_context>

<pallas_src>
import functools

import jax
import jax.numpy as jnp
from jax.experimental import pallas as pl
from jax.experimental.pallas import tpu as pltpu

LANE = 128


def _round_up(x, m):
    return (x + m - 1) // m * m


def gatenet_kernel(x_ref, w1_ref, b1_ref, w2_ref, b2_ref, o_ref):
    # x_ref:  (tm, d_model)        bf16
    # w1_ref: (d_model, d_hidden)  bf16 ; b1_ref: (1, d_hidden) f32
    # w2_ref: (d_hidden, d_out_p)  bf16 ; b2_ref: (1, d_out_p)  f32
    # o_ref:  (tm, d_out_p)        f32
    h = jnp.dot(x_ref[...], w1_ref[...], preferred_element_type=jnp.float32)
    h = jnp.maximum(h + b1_ref[...], 0.0)                      # bias + ReLU in f32
    # TODO(synk): Dropout(p=0.0) is the identity; nonzero p would need
    # pltpu.prng_seed / pltpu.prng_random_bits masking here.
    y = jnp.dot(h.astype(w2_ref.dtype), w2_ref[...],
                preferred_element_type=jnp.float32) + b2_ref[...]
    # sigmoid(y) = 1 / (1 + exp(-y)); exp and the approximate reciprocal both run on EUP.
    o_ref[...] = pl.reciprocal(1.0 + jnp.exp(-y), approx=True).astype(o_ref.dtype)


@functools.partial(jax.jit, static_argnames=("tm", "single_buffer_weights"))
def gatenet_forward(x, w1_t, b1, w2_t, b2, *, tm=512, single_buffer_weights=True):
    """x: (rows, d_model) f32 -> (rows, d_output) f32. Weights pre-transposed to (in, out)."""
    rows, d_model = x.shape
    d_hidden = w1_t.shape[1]
    d_output = w2_t.shape[1]
    out_dtype = x.dtype

    # ---- static tiling decisions (shapes are static under jit) ----
    d_out_p = _round_up(d_output, LANE)              # lane-dense output stores
    tm_req = max(LANE, (tm // LANE) * LANE)          # 128-aligned row tile
    tm_eff = min(tm_req, _round_up(rows, LANE))
    # Keep >= 2 grid steps when rows allow so the "parallel" axis can shard across
    # v7x's two TensorCores (single-TC chips are unaffected).
    if tm_eff > LANE and _round_up(rows, tm_eff) == tm_eff:
        tm_eff = max(LANE, (tm_eff // 2) // LANE * LANE)
    rows_p = _round_up(rows, tm_eff)
    grid = (rows_p // tm_eff,)

    # ---- bf16 datapath for the MXU; biases stay f32 ----
    x_p = jnp.pad(x.astype(jnp.bfloat16), ((0, rows_p - rows), (0, 0)))
    w1b = w1_t.astype(jnp.bfloat16)
    w2b = jnp.pad(w2_t.astype(jnp.bfloat16), ((0, 0), (0, d_out_p - d_output)))
    b1f = b1.astype(jnp.float32)
    b2f = jnp.pad(b2.astype(jnp.float32), ((0, 0), (0, d_out_p - d_output)))

    # ---- VMEM budget: double-buffered x/out tiles + resident weights + intermediates ----
    BF16, F32 = 2, 4
    vmem_need = (
        2 * tm_eff * d_model * BF16                              # x tiles (2 bufs)
        + 2 * tm_eff * d_out_p * F32                             # out tiles (2 bufs)
        + (1 if single_buffer_weights else 2)
        * (d_model * d_hidden * BF16 + d_hidden * F32
           + d_hidden * d_out_p * BF16 + d_out_p * F32)          # W1/b1/W2/b2 residency
        + tm_eff * d_hidden * F32                                # h intermediate
        + tm_eff * d_out_p * F32                                 # y / sigmoid intermediate
    )
    vmem_limit = int(min(64 * 1024 * 1024, max(32 * 1024 * 1024, 2 * vmem_need)))

    def w_spec(shape):
        # Weights/biases are grid-invariant: single-buffer them (rotation buys nothing,
        # and it halves their VMEM footprint — matters on v7x's 64 MiB VMEM).
        if single_buffer_weights:
            return pl.BlockSpec(shape, lambda i: (0, 0), pipeline_mode=pl.Buffered(1))
        return pl.BlockSpec(shape, lambda i: (0, 0))

    out_p = pl.pallas_call(
        gatenet_kernel,
        out_shape=jax.ShapeDtypeStruct((rows_p, d_out_p), out_dtype),
        grid_spec=pltpu.PrefetchScalarGridSpec(
            num_scalar_prefetch=0,
            grid=grid,
            in_specs=[
                pl.BlockSpec((tm_eff, d_model), lambda i: (i, 0)),   # x row tile
                w_spec((d_model, d_hidden)),                         # W1 (full)
                w_spec((1, d_hidden)),                               # b1
                w_spec((d_hidden, d_out_p)),                         # W2 (lane-padded)
                w_spec((1, d_out_p)),                                # b2 (lane-padded)
            ],
            out_specs=pl.BlockSpec((tm_eff, d_out_p), lambda i: (i, 0)),
        ),
        compiler_params=pltpu.CompilerParams(
            dimension_semantics=("parallel",),
            vmem_limit_bytes=vmem_limit,
        ),
    )(x_p, w1b, b1f, w2b, b2f)

    return out_p[:rows, :d_output]


def init_gatenet_params(key, d_model, d_hidden, d_output, dtype=jnp.float32):
    """Deterministic param init mirroring nn.Linear shapes (weights returned transposed)."""
    k1, k2, k3, k4 = jax.random.split(key, 4)
    s1 = 1.0 / (d_model ** 0.5)
    s2 = 1.0 / (d_hidden ** 0.5)
    w1 = jax.random.uniform(k1, (d_hidden, d_model), dtype, -s1, s1)   # PyTorch (out, in)
    b1 = jax.random.uniform(k2, (d_hidden,), dtype, -s1, s1)
    w2 = jax.random.uniform(k3, (d_output, d_hidden), dtype, -s2, s2)
    b2 = jax.random.uniform(k4, (d_output,), dtype, -s2, s2)
    # pre-transpose for the kernel; biases as (1, F) rows for 2-D broadcast
    return w1.T, b1.reshape(1, -1), w2.T, b2.reshape(1, -1)


if __name__ == "__main__":
    batch, seq = 2, 8
    d_model, d_hidden, d_output = 32, 64, 16

    key = jax.random.PRNGKey(0)
    k_in, k_par = jax.random.split(key)

    inputs = jax.random.normal(k_in, (batch, seq, d_model), jnp.float32)
    w1_t, b1, w2_t, b2 = init_gatenet_params(k_par, d_model, d_hidden, d_output)

    x2d = inputs.reshape(batch * seq, d_model)
    try:
        out2d = gatenet_forward(x2d, w1_t, b1, w2_t, b2)
    except Exception:
        # This Pallas build rejected pipeline_mode=pl.Buffered(1) on the resident weights;
        # fall back to default (double-buffered) weight residency.
        out2d = gatenet_forward(x2d, w1_t, b1, w2_t, b2, single_buffer_weights=False)
    out = out2d.reshape(batch, seq, d_output)
    jax.block_until_ready(out)

    # f32 reference (kernel runs the matmuls in bf16 with f32 accumulation)
    ref = jax.nn.sigmoid(
        jnp.maximum(x2d @ w1_t + b1, 0.0) @ w2_t + b2
    ).reshape(batch, seq, d_output)
    assert jnp.allclose(out, ref, atol=2e-2, rtol=2e-2), float(jnp.max(jnp.abs(out - ref)))

    print("KERNEL_OK")
</pallas_src>

<mosaic_0001>
module attributes {stable_mosaic.version = 11 : i64} {
  func.func @gatenet_kernel(%arg0: i32, %arg1: memref<128x32xbf16, #tpu.memory_space<vmem>>, %arg2: memref<32x64xbf16, #tpu.memory_space<vmem>>, %arg3: memref<1x64xf32, #tpu.memory_space<vmem>>, %arg4: memref<64x128xbf16, #tpu.memory_space<vmem>>, %arg5: memref<1x128xf32, #tpu.memory_space<vmem>>, %arg6: memref<128x128xf32, #tpu.memory_space<vmem>>) attributes {dimension_semantics = [#tpu.dimension_semantics<parallel>], iteration_bounds = array<i64: 1>, scalar_prefetch = 0 : i64, scratch_operands = 0 : i64, tpu.core_type = #tpu.core_type<tc>, window_params = [{transform_indices = @transform_0, window_bounds = array<i64: 128, 32>}, {pipeline_mode = #tpu.pipeline_mode<synchronous>, transform_indices = @transform_1, window_bounds = array<i64: 32, 64>}, {pipeline_mode = #tpu.pipeline_mode<synchronous>, transform_indices = @transform_2, window_bounds = array<i64: 1, 64>}, {pipeline_mode = #tpu.pipeline_mode<synchronous>, transform_indices = @transform_3, window_bounds = array<i64: 64, 128>}, {pipeline_mode = #tpu.pipeline_mode<synchronous>, transform_indices = @transform_4, window_bounds = array<i64: 1, 128>}, {transform_indices = @transform_5, window_bounds = array<i64: 128, 128>}]} {
    %c0 = arith.constant 0 : index
    %c0_0 = arith.constant 0 : index
    %0 = vector.load %arg1[%c0, %c0_0] : memref<128x32xbf16, #tpu.memory_space<vmem>>, vector<128x32xbf16>
    %c0_1 = arith.constant 0 : index
    %c0_2 = arith.constant 0 : index
    %1 = vector.load %arg2[%c0_1, %c0_2] : memref<32x64xbf16, #tpu.memory_space<vmem>>, vector<32x64xbf16>
    %cst = arith.constant dense<0.000000e+00> : vector<128x64xf32>
    %2 = tpu.matmul %0, %1, %cst {dimension_numbers = #tpu.dot_dimension_numbers<[1], [0], [0], [1], [0, 0, 1, 1], [], []>} : vector<128x32xbf16>, vector<32x64xbf16>, vector<128x64xf32> -> vector<128x64xf32>
    %c0_3 = arith.constant 0 : index
    %c0_4 = arith.constant 0 : index
    %3 = vector.load %arg3[%c0_3, %c0_4] : memref<1x64xf32, #tpu.memory_space<vmem>>, vector<1x64xf32>
    %4 = vector.broadcast %3 : vector<1x64xf32> to vector<128x64xf32>
    %5 = arith.addf %2, %4 : vector<128x64xf32>
    %cst_5 = arith.constant 0.000000e+00 : f32
    %6 = vector.broadcast %cst_5 : f32 to vector<128x64xf32>
    %7 = arith.maximumf %5, %6 : vector<128x64xf32>
    %8 = arith.truncf %7 : vector<128x64xf32> to vector<128x64xbf16>
    %c0_6 = arith.constant 0 : index
    %c0_7 = arith.constant 0 : index
    %9 = vector.load %arg4[%c0_6, %c0_7] : memref<64x128xbf16, #tpu.memory_space<vmem>>, vector<64x128xbf16>
    %cst_8 = arith.constant dense<0.000000e+00> : vector<128x128xf32>
    %10 = tpu.matmul %8, %9, %cst_8 {dimension_numbers = #tpu.dot_dimension_numbers<[1], [0], [0], [1], [0, 0, 1, 1], [], []>} : vector<128x64xbf16>, vector<64x128xbf16>, vector<128x128xf32> -> vector<128x128xf32>
    %c0_9 = arith.constant 0 : index
    %c0_10 = arith.constant 0 : index
    %11 = vector.load %arg5[%c0_9, %c0_10] : memref<1x128xf32, #tpu.memory_space<vmem>>, vector<1x128xf32>
    %12 = vector.broadcast %11 : vector<1x128xf32> to vector<128x128xf32>
    %13 = arith.addf %10, %12 : vector<128x128xf32>
    %cst_11 = arith.constant 0.000000e+00 : f32
    %14 = vector.broadcast %cst_11 : f32 to vector<128x128xf32>
    %15 = arith.subf %14, %13 : vector<128x128xf32>
    %16 = math.exp %15 : vector<128x128xf32>
    %cst_12 = arith.constant 1.000000e+00 : f32
    %17 = vector.broadcast %cst_12 : f32 to vector<128x128xf32>
    %18 = arith.addf %17, %16 : vector<128x128xf32>
    %19 = tpu.reciprocal %18 {approx = true} : vector<128x128xf32> -> vector<128x128xf32>
    %c0_13 = arith.constant 0 : index
    %c0_14 = arith.constant 0 : index
    %20 = vector.load %arg6[%c0_13, %c0_14] : memref<128x128xf32, #tpu.memory_space<vmem>>, vector<128x128xf32>
    tpu.vector_store %arg6[%c0_13, %c0_14], %19 {strides = array<i32>} : memref<128x128xf32, #tpu.memory_space<vmem>>, vector<128x128xf32>,
    return
  }
  func.func @transform_0(%arg0: i32) -> (i32, i32) {
    %c0_i32 = arith.constant 0 : i32
    %c0_i32_0 = arith.constant 0 : i32
    return %arg0, %c0_i32 : i32, i32
  }
  func.func @transform_1(%arg0: i32) -> (i32, i32) {
    %c0_i32 = arith.constant 0 : i32
    %c0_i32_0 = arith.constant 0 : i32
    %c0_i32_1 = arith.constant 0 : i32
    return %c0_i32, %c0_i32_0 : i32, i32
  }
  func.func @transform_2(%arg0: i32) -> (i32, i32) {
    %c0_i32 = arith.constant 0 : i32
    %c0_i32_0 = arith.constant 0 : i32
    %c0_i32_1 = arith.constant 0 : i32
    return %c0_i32, %c0_i32_0 : i32, i32
  }
  func.func @transform_3(%arg0: i32) -> (i32, i32) {
    %c0_i32 = arith.constant 0 : i32
    %c0_i32_0 = arith.constant 0 : i32
    %c0_i32_1 = arith.constant 0 : i32
    return %c0_i32, %c0_i32_0 : i32, i32
  }
  func.func @transform_4(%arg0: i32) -> (i32, i32) {
    %c0_i32 = arith.constant 0 : i32
    %c0_i32_0 = arith.constant 0 : i32
    %c0_i32_1 = arith.constant 0 : i32
    return %c0_i32, %c0_i32_0 : i32, i32
  }
  func.func @transform_5(%arg0: i32) -> (i32, i32) {
    %c0_i32 = arith.constant 0 : i32
    %c0_i32_0 = arith.constant 0 : i32
    return %arg0, %c0_i32 : i32, i32
  }
}

module attributes {stable_mosaic.version = 11 : i64} {
  func.func @gatenet_kernel(%arg0: i32, %arg1: memref<128x32xbf16, #tpu.memory_space<vmem>>, %arg2: memref<32x64xbf16, #tpu.memory_space<vmem>>, %arg3: memref<1x64xf32, #tpu.memory_space<vmem>>, %arg4: memref<64x128xbf16, #tpu.memory_space<vmem>>, %arg5: memref<1x128xf32, #tpu.memory_space<vmem>>, %arg6: memref<128x128xf32, #tpu.memory_space<vmem>>) attributes {dimension_semantics = [#tpu.dimension_semantics<parallel>], iteration_bounds = array<i64: 1>, scalar_prefetch = 0 : i64, scratch_operands = 0 : i64, tpu.core_type = #tpu.core_type<tc>, window_params = [{transform_indices = @transform_0, window_bounds = array<i64: 128, 32>}, {pipeline_mode = #tpu.pipeline_mode<synchronous>, transform_indices = @transform_1, window_bounds = array<i64: 32, 64>}, {pipeline_mode = #tpu.pipeline_mode<synchronous>, transform_indices = @transform_2, window_bounds = array<i64: 1, 64>}, {pipeline_mode = #tpu.pipeline_mode<synchronous>, transform_indices = @transform_3, window_bounds = array<i64: 64, 128>}, {pipeline_mode = #tpu.pipeline_mode<synchronous>, transform_indices = @transform_4, window_bounds = array<i64: 1, 128>}, {transform_indices = @transform_5, window_bounds = array<i64: 128, 128>}]} {
    %c0 = arith.constant 0 : index
    %c0_0 = arith.constant 0 : index
    %0 = vector.load %arg1[%c0, %c0_0] : memref<128x32xbf16, #tpu.memory_space<vmem>>, vector<128x32xbf16>
    %c0_1 = arith.constant 0 : index
    %c0_2 = arith.constant 0 : index
    %1 = vector.load %arg2[%c0_1, %c0_2] : memref<32x64xbf16, #tpu.memory_space<vmem>>, vector<32x64xbf16>
    %cst = arith.constant dense<0.000000e+00> : vector<128x64xf32>
    %2 = tpu.matmul %0, %1, %cst {dimension_numbers = #tpu.dot_dimension_numbers<[1], [0], [0], [1], [0, 0, 1, 1], [], []>} : vector<128x32xbf16>, vector<32x64xbf16>, vector<128x64xf32> -> vector<128x64xf32>
    %c0_3 = arith.constant 0 : index
    %c0_4 = arith.constant 0 : index
    %3 = vector.load %arg3[%c0_3, %c0_4] : memref<1x64xf32, #tpu.memory_space<vmem>>, vector<1x64xf32>
    %4 = vector.broadcast %3 : vector<1x64xf32> to vector<128x64xf32>
    %5 = arith.addf %2, %4 : vector<128x64xf32>
    %cst_5 = arith.constant 0.000000e+00 : f32
    %6 = vector.broadcast %cst_5 : f32 to vector<128x64xf32>
    %7 = arith.maximumf %5, %6 : vector<128x64xf32>
    %8 = arith.truncf %7 : vector<128x64xf32> to vector<128x64xbf16>
    %c0_6 = arith.constant 0 : index
    %c0_7 = arith.constant 0 : index
    %9 = vector.load %arg4[%c0_6, %c0_7] : memref<64x128xbf16, #tpu.memory_space<vmem>>, vector<64x128xbf16>
    %cst_8 = arith.constant dense<0.000000e+00> : vector<128x128xf32>
    %10 = tpu.matmul %8, %9, %cst_8 {dimension_numbers = #tpu.dot_dimension_numbers<[1], [0], [0], [1], [0, 0, 1, 1], [], []>} : vector<128x64xbf16>, vector<64x128xbf16>, vector<128x128xf32> -> vector<128x128xf32>
    %c0_9 = arith.constant 0 : index
    %c0_10 = arith.constant 0 : index
    %11 = vector.load %arg5[%c0_9, %c0_10] : memref<1x128xf32, #tpu.memory_space<vmem>>, vector<1x128xf32>
    %12 = vector.broadcast %11 : vector<1x128xf32> to vector<128x128xf32>
    %13 = arith.addf %10, %12 : vector<128x128xf32>
    %cst_11 = arith.constant 0.000000e+00 : f32
    %14 = vector.broadcast %cst_11 : f32 to vector<128x128xf32>
    %15 = arith.subf %14, %13 : vector<128x128xf32>
    %16 = math.exp %15 : vector<128x128xf32>
    %cst_12 = arith.constant 1.000000e+00 : f32
    %17 = vector.broadcast %cst_12 : f32 to vector<128x128xf32>
    %18 = arith.addf %17, %16 : vector<128x128xf32>
    %19 = tpu.reciprocal %18 {approx = true} : vector<128x128xf32> -> vector<128x128xf32>
    %c0_13 = arith.constant 0 : index
    %c0_14 = arith.constant 0 : index
    %20 = vector.load %arg6[%c0_13, %c0_14] : memref<128x128xf32, #tpu.memory_space<vmem>>, vector<128x128xf32>
    tpu.vector_store %arg6[%c0_13, %c0_14], %19 {strides = array<i32>} : memref<128x128xf32, #tpu.memory_space<vmem>>, vector<128x128xf32>,
    return
  }
  func.func @transform_0(%arg0: i32) -> (i32, i32) {
    %c0_i32 = arith.constant 0 : i32
    %c0_i32_0 = arith.constant 0 : i32
    return %arg0, %c0_i32 : i32, i32
  }
  func.func @transform_1(%arg0: i32) -> (i32, i32) {
    %c0_i32 = arith.constant 0 : i32
    %c0_i32_0 = arith.constant 0 : i32
    %c0_i32_1 = arith.constant 0 : i32
    return %c0_i32, %c0_i32_0 : i32, i32
  }
  func.func @transform_2(%arg0: i32) -> (i32, i32) {
    %c0_i32 = arith.constant 0 : i32
    %c0_i32_0 = arith.constant 0 : i32
    %c0_i32_1 = arith.constant 0 : i32
    return %c0_i32, %c0_i32_0 : i32, i32
  }
  func.func @transform_3(%arg0: i32) -> (i32, i32) {
    %c0_i32 = arith.constant 0 : i32
    %c0_i32_0 = arith.constant 0 : i32
    %c0_i32_1 = arith.constant 0 : i32
    return %c0_i32, %c0_i32_0 : i32, i32
  }
  func.func @transform_4(%arg0: i32) -> (i32, i32) {
    %c0_i32 = arith.constant 0 : i32
    %c0_i32_0 = arith.constant 0 : i32
    %c0_i32_1 = arith.constant 0 : i32
    return %c0_i32, %c0_i32_0 : i32, i32
  }
  func.func @transform_5(%arg0: i32) -> (i32, i32) {
    %c0_i32 = arith.constant 0 : i32
    %c0_i32_0 = arith.constant 0 : i32
    return %arg0, %c0_i32 : i32, i32
  }
}

</mosaic_0001>

<bundles_post_ra>
// kernel: gatenet_forward.1
= control target key start
LH: loop header
LB: loop body
LE: loop exit
PB: predicated region body
PF: predicated region fallthrough
CT: control target
= control target key end

     0   :  { %vm100_vm0 = vcmask 261120   ;;  %vm285_vm1 = vcmask 523264   ;;  %s843_s1 = inlined_call_operand.vmem [shape: bf16[32,64], index: 1, kind: input, shape index: {}]   ;;  %s844_s0 = inlined_call_operand.vmem [shape: bf16[128,32], index: 0, kind: input, shape index: {}]   ;;  %s845_s3 = inlined_call_operand.vmem [shape: bf16[64,128], index: 3, kind: input, shape index: {}]   ;;  %s846_s2 = inlined_call_operand.vmem [shape: f32[1,64], index: 2, kind: input, shape index: {}]   ;;  %s847_s4 = inlined_call_operand.vmem [shape: f32[1,128], index: 4, kind: input, shape index: {}]   ;;  %s848_s5 = inlined_call_operand.vmem [shape: f32[128,128], index: 5, kind: output, shape index: {}]  }
   0x1   :  { %v605_v0 = vld [vmem:[%s843_s1] sm:$0xff]   ;;  %v606_v1 = vld [vmem:[%s843_s1 + $0x8] sm:$0xff]   ;;  %v609_v4 = vld [vmem:[%s844_s0 + $0x10] sm:$0xff]  }
   0x2   :  { %561 = vmatprep.subr.bf16.mxu0 %v605_v0  ;;  %v607_v2 = vld [vmem:[%s844_s0] sm:$0xff]   ;;  %v608_v3 = vld [vmem:[%s844_s0 + $0x8] sm:$0xff]   ;;  %v610_v7 = vld [vmem:[%s844_s0 + $0x18] sm:$0xff]  }
   0x3   :  { %562 = vmatpush3.bf16.msra.mxu0 %v605_v0  ;;  %565 = vmatprep.mubr.msk.bf16.mxu0 %vm100_vm0, %v607_v2  ;;  %v615_v5 = vld [vmem:[%s845_s3] sm:$0xff]   ;;  %v616_v6 = vld [vmem:[%s845_s3 + $0x8] sm:$0xff]   ;;  %v613_v10 = vld [vmem:[%s844_s0 + $0x30] sm:$0xff]  }
   0x4   :  { %563 = vmatprep.subr.bf16.mxu0 %v606_v1  ;;  %581 = vmatprep.subr.bf16.mxu1 %v615_v5  ;;  %v611_v8 = vld [vmem:[%s844_s0 + $0x20] sm:$0xff]   ;;  %v612_v9 = vld [vmem:[%s844_s0 + $0x28] sm:$0xff]   ;;  %v614_v11 = vld [vmem:[%s844_s0 + $0x38] sm:$0xff]  }
   0x5   :  { %582 = vmatpush3.bf16.msra.mxu1 %v615_v5  ;;  %v617_v12 = vld [vmem:[%s845_s3 + $0x10] sm:$0xff]   ;;  %v618_v13 = vld [vmem:[%s845_s3 + $0x18] sm:$0xff]   ;;  %v507_v14 = vld [vmem:[%s846_s2] ss:$0 sm:$0xff] }
   0x6   :  { %583 = vmatprep.subr.bf16.mxu1 %v616_v6 }
   0x7   :  { %564 = vmatpush3.bf16.msra.mxu0 %v606_v1 }
   0x9   :  { %584 = vmatpush3.bf16.msra.mxu1 %v616_v6 }
   0xa   :  { %566 = vmatmul.mubr.msk.bf16.vlgmr.msra.gmra.mrb[0].mxu0 %vm100_vm0, %v608_v3  ;;  %585 = vmatprep.subr.bf16.mxu1 %v617_v12 }
   0xb   :  { %569 = vmatprep.mubr.msk.bf16.mxu0 %vm100_vm0, %v609_v4 }
   0xd   :  { %586 = vmatpush3.bf16.msra.mxu1 %v617_v12 }
   0xe   :  { %587 = vmatprep.subr.bf16.mxu1 %v618_v13 }
  0x11   :  { %588 = vmatpush3.bf16.msra.mxu1 %v618_v13 }
  0x12   :  { %570 = vmatmul.mubr.msk.bf16.gmra.mrb[4].mxu0 %vm100_vm0, %v610_v7  ;;  %v777_v7 = vld [vmem:[%s847_s4] ss:$0 sm:$0xff] }
  0x13   :  { %573 = vmatprep.mubr.msk.bf16.mxu0 %vm100_vm0, %v611_v8 }
  0x1a   :  { %574 = vmatmul.mubr.msk.bf16.gmra.mrb[8].mxu0 %vm100_vm0, %v612_v9 }
  0x1b   :  { %577 = vmatprep.mubr.msk.bf16.mxu0 %vm100_vm0, %v613_v10 }
  0x22   :  { %578 = vmatmul.mubr.msk.bf16.gmra.mrb[12].mxu0 %vm100_vm0, %v614_v11 }
  0xdd   :  { %v567_v15 = vpop.f32.mrb[0].mxu0 }
  0xde   :  { %v168_v16 = vadd.f32 %v567_v15, %v507_v14  ;;  %v159_v17 = vpop.f32.mrb[1].mxu0 }
  0xdf   :  { %v160_v18 = vadd.f32 %v507_v14, %v159_v17  ;;  %v568_v19 = vpop.f32.mrb[2].mxu0 }
  0xe0   :  { %v171_v20 = vadd.f32 %v568_v19, %v507_v14  ;;  %v162_v21 = vpop.f32.mrb[3].mxu0  ;;  %v224_v23 = vmax.f32 %v168_v16, 0.0 }
  0xe1   :  { %v163_v22 = vadd.f32 %v507_v14, %v162_v21  ;;  %v222_v25 = vmax.f32 %v160_v18, 0.0 }
  0xe2   :  { %v225_v24 = vmax.f32 %v171_v20, 0.0 }
  0xe3   :  { %v223_v26 = vmax.f32 %v163_v22, 0.0 }
  0xe4   :  { %v239_v27 = vpack.c.bf16 %v225_v24, %v224_v23 }
  0xe5   :  { %v571_v28 = vpop.f32.mrb[4].mxu0  ;;  %v238_v29 = vpack.c.bf16 %v223_v26, %v222_v25 }
  0xe6   :  { %v184_v30 = vadd.f32 %v571_v28, %v507_v14  ;;  %v175_v31 = vpop.f32.mrb[5].mxu0 }
  0xe7   :  { %v176_v32 = vadd.f32 %v507_v14, %v175_v31  ;;  %v572_v33 = vpop.f32.mrb[6].mxu0  ;;  %589 = vmatprep.mubr.msk.bf16.mxu1 %vm285_vm1, %v238_v29 }
  0xe8   :  { %v187_v34 = vadd.f32 %v572_v33, %v507_v14  ;;  %v178_v35 = vpop.f32.mrb[7].mxu0  ;;  %590 = vmatmul.mubr.msk.bf16.vlgmr.msra.gmra.mrb[0].mxu1 %vm285_vm1, %v239_v27  ;;  %v228_v37 = vmax.f32 %v184_v30, 0.0 }
  0xe9   :  { %v179_v36 = vadd.f32 %v507_v14, %v178_v35  ;;  %v226_v39 = vmax.f32 %v176_v32, 0.0 }
  0xea   :  { %v229_v38 = vmax.f32 %v187_v34, 0.0 }
  0xeb   :  { %v227_v40 = vmax.f32 %v179_v36, 0.0 }
  0xec   :  { %v241_v41 = vpack.c.bf16 %v229_v38, %v228_v37 }
  0xed   :  { %v240_v42 = vpack.c.bf16 %v227_v40, %v226_v39  ;;  %v575_v43 = vpop.f32.mrb[8].mxu0 }
  0xee   :  { %v200_v44 = vadd.f32 %v575_v43, %v507_v14  ;;  %v191_v45 = vpop.f32.mrb[9].mxu0 }
  0xef   :  { %v192_v46 = vadd.f32 %v507_v14, %v191_v45  ;;  %v576_v47 = vpop.f32.mrb[10].mxu0  ;;  %593 = vmatprep.mubr.msk.bf16.mxu1 %vm285_vm1, %v240_v42 }
  0xf0   :  { %v203_v48 = vadd.f32 %v576_v47, %v507_v14  ;;  %v194_v49 = vpop.f32.mrb[11].mxu0  ;;  %594 = vmatmul.mubr.msk.bf16.gmra.mrb[4].mxu1 %vm285_vm1, %v241_v41  ;;  %v232_v51 = vmax.f32 %v200_v44, 0.0 }
  0xf1   :  { %v195_v50 = vadd.f32 %v507_v14, %v194_v49  ;;  %v230_v53 = vmax.f32 %v192_v46, 0.0 }
  0xf2   :  { %v233_v52 = vmax.f32 %v203_v48, 0.0 }
  0xf3   :  { %v231_v54 = vmax.f32 %v195_v50, 0.0 }
  0xf4   :  { %v243_v55 = vpack.c.bf16 %v233_v52, %v232_v51 }
  0xf5   :  { %v242_v56 = vpack.c.bf16 %v231_v54, %v230_v53  ;;  %v579_v57 = vpop.f32.mrb[12].mxu0 }
  0xf6   :  { %v216_v58 = vadd.f32 %v579_v57, %v507_v14  ;;  %v207_v59 = vpop.f32.mrb[13].mxu0 }
  0xf7   :  { %v208_v60 = vadd.f32 %v507_v14, %v207_v59  ;;  %v580_v61 = vpop.f32.mrb[14].mxu0  ;;  %597 = vmatprep.mubr.msk.bf16.mxu1 %vm285_vm1, %v242_v56 }
  0xf8   :  { %v219_v62 = vadd.f32 %v580_v61, %v507_v14  ;;  %v210_v63 = vpop.f32.mrb[15].mxu0  ;;  %598 = vmatmul.mubr.msk.bf16.gmra.mrb[8].mxu1 %vm285_vm1, %v243_v55  ;;  %v236_v1 = vmax.f32 %v216_v58, 0.0 }
  0xf9   :  { %v211_v0 = vadd.f32 %v507_v14, %v210_v63  ;;  %v234_v3 = vmax.f32 %v208_v60, 0.0 }
  0xfa   :  { %v237_v2 = vmax.f32 %v219_v62, 0.0 }
  0xfb   :  { %v235_v4 = vmax.f32 %v211_v0, 0.0 }
  0xfc   :  { %v245_v5 = vpack.c.bf16 %v237_v2, %v236_v1 }
  0xfd   :  { %v244_v6 = vpack.c.bf16 %v235_v4, %v234_v3 }
  0xff   :  { %601 = vmatprep.mubr.msk.bf16.mxu1 %vm285_vm1, %v244_v6 }
 0x100   :  { %602 = vmatmul.mubr.msk.bf16.gmra.mrb[12].mxu1 %vm285_vm1, %v245_v5 }
 0x1bb   :  { %v591_v8 = vpop.f32.mrb[0].mxu1 }
 0x1bc   :  { %v353_v9 = vadd.f32 %v591_v8, %v777_v7  ;;  %v344_v10 = vpop.f32.mrb[1].mxu1 }
 0x1bd   :  { %v345_v11 = vadd.f32 %v777_v7, %v344_v10  ;;  %v592_v12 = vpop.f32.mrb[2].mxu1 }
 0x1be   :  { %v409_v13 = vsub.f32 0.0, %v353_v9  ;;  %v356_v14 = vadd.f32 %v592_v12, %v777_v7  ;;  %v347_v15 = vpop.f32.mrb[3].mxu1 }
 0x1bf   :  { %v407_v16 = vsub.f32 0.0, %v345_v11  ;;  %v348_v17 = vadd.f32 %v777_v7, %v347_v15 }
 0x1c0   :  { %v427_v18 = vmul.f32 1.442695, %v409_v13  ;;  %v410_v19 = vsub.f32 0.0, %v356_v14 }
 0x1c1   :  { %v423_v20 = vmul.f32 1.442695, %v407_v16  ;;  %v408_v21 = vsub.f32 0.0, %v348_v17 }
 0x1c2   :  { %619 = vpow2.f32 %v427_v18  ;;  %v429_v22 = vmul.f32 1.442695, %v410_v19 }
 0x1c3   :  { %621 = vpow2.f32 %v423_v20  ;;  %v425_v23 = vmul.f32 1.442695, %v408_v21  ;;  %v595_v24 = vpop.f32.mrb[4].mxu1 }
 0x1c4   :  { %623 = vpow2.f32 %v429_v22  ;;  %v369_v25 = vadd.f32 %v595_v24, %v777_v7  ;;  %v360_v26 = vpop.f32.mrb[5].mxu1 }
 0x1c5   :  { %625 = vpow2.f32 %v425_v23  ;;  %v361_v27 = vadd.f32 %v777_v7, %v360_v26  ;;  %v596_v28 = vpop.f32.mrb[6].mxu1 }
 0x1c6   :  { %v413_v29 = vsub.f32 0.0, %v369_v25  ;;  %v372_v30 = vadd.f32 %v596_v28, %v777_v7  ;;  %v363_v31 = vpop.f32.mrb[7].mxu1 }
 0x1c7   :  { %v411_v32 = vsub.f32 0.0, %v361_v27  ;;  %v364_v33 = vadd.f32 %v777_v7, %v363_v31 }
 0x1c8   :  { %v435_v34 = vmul.f32 1.442695, %v413_v29  ;;  %v414_v35 = vsub.f32 0.0, %v372_v30 }
 0x1c9   :  { %v431_v36 = vmul.f32 1.442695, %v411_v32  ;;  %v412_v37 = vsub.f32 0.0, %v364_v33 }
 0x1ca   :  { %627 = vpow2.f32 %v435_v34  ;;  %v437_v38 = vmul.f32 1.442695, %v414_v35 }
 0x1cb   :  { %629 = vpow2.f32 %v431_v36  ;;  %v433_v39 = vmul.f32 1.442695, %v412_v37  ;;  %v599_v40 = vpop.f32.mrb[8].mxu1 }
 0x1cc   :  { %v620_v41 = vpop.eup %619  ;;  %631 = vpow2.f32 %v437_v38  ;;  %v385_v42 = vadd.f32 %v599_v40, %v777_v7  ;;  %v376_v43 = vpop.f32.mrb[9].mxu1 }
 0x1cd   :  { %v622_v44 = vpop.eup %621  ;;  %v457_v45 = vadd.f32 1.0, %v620_v41  ;;  %633 = vpow2.f32 %v433_v39  ;;  %v377_v46 = vadd.f32 %v777_v7, %v376_v43  ;;  %v600_v47 = vpop.f32.mrb[10].mxu1 }
 0x1ce   :  { %v624_v48 = vpop.eup %623  ;;  %v455_v49 = vadd.f32 1.0, %v622_v44  ;;  %v417_v50 = vsub.f32 0.0, %v385_v42  ;;  %v388_v51 = vadd.f32 %v600_v47, %v777_v7  ;;  %v379_v52 = vpop.f32.mrb[11].mxu1 }
 0x1cf   :  { %v626_v53 = vpop.eup %625  ;;  %635 = vrcp.f32 %v457_v45  ;;  %v458_v54 = vadd.f32 1.0, %v624_v48  ;;  %v415_v55 = vsub.f32 0.0, %v377_v46  ;;  %v380_v56 = vadd.f32 %v777_v7, %v379_v52 }
 0x1d0   :  { %637 = vrcp.f32 %v455_v49  ;;  %v456_v57 = vadd.f32 1.0, %v626_v53  ;;  %v443_v58 = vmul.f32 1.442695, %v417_v50  ;;  %v418_v59 = vsub.f32 0.0, %v388_v51 }
 0x1d1   :  { %639 = vrcp.f32 %v458_v54  ;;  %v439_v60 = vmul.f32 1.442695, %v415_v55  ;;  %v416_v61 = vsub.f32 0.0, %v380_v56 }
 0x1d2   :  { %641 = vrcp.f32 %v456_v57  ;;  %v445_v62 = vmul.f32 1.442695, %v418_v59 }
 0x1d3   :  { %643 = vpow2.f32 %v443_v58  ;;  %v441_v63 = vmul.f32 1.442695, %v416_v61  ;;  %v603_v0 = vpop.f32.mrb[12].mxu1 }
 0x1d4   :  { %v628_v1 = vpop.eup %627  ;;  %645 = vpow2.f32 %v439_v60  ;;  %v401_v2 = vadd.f32 %v603_v0, %v777_v7  ;;  %v392_v3 = vpop.f32.mrb[13].mxu1 }
 0x1d5   :  { %v630_v4 = vpop.eup %629  ;;  %v461_v5 = vadd.f32 1.0, %v628_v1  ;;  %647 = vpow2.f32 %v445_v62  ;;  %v393_v6 = vadd.f32 %v777_v7, %v392_v3  ;;  %v604_v8 = vpop.f32.mrb[14].mxu1 }
 0x1d6   :  { %v632_v9 = vpop.eup %631  ;;  %v459_v10 = vadd.f32 1.0, %v630_v4  ;;  %649 = vpow2.f32 %v441_v63  ;;  %v421_v11 = vsub.f32 0.0, %v401_v2  ;;  %v404_v12 = vadd.f32 %v604_v8, %v777_v7  ;;  %v395_v13 = vpop.f32.mrb[15].mxu1 }
 0x1d7   :  { %v634_v14 = vpop.eup %633  ;;  %651 = vrcp.f32 %v461_v5  ;;  %v462_v15 = vadd.f32 1.0, %v632_v9  ;;  %v419_v16 = vsub.f32 0.0, %v393_v6  ;;  %v396_v17 = vadd.f32 %v777_v7, %v395_v13 }
 0x1d8   :  { %653 = vrcp.f32 %v459_v10  ;;  %v460_v18 = vadd.f32 1.0, %v634_v14  ;;  %v451_v19 = vmul.f32 1.442695, %v421_v11  ;;  %v422_v20 = vsub.f32 0.0, %v404_v12 }
 0x1d9   :  { %v636_v21 = vpop.eup %635  ;;  %655 = vrcp.f32 %v462_v15  ;;  %v447_v22 = vmul.f32 1.442695, %v419_v16  ;;  %v420_v23 = vsub.f32 0.0, %v396_v17 }
 0x1da   :  { %v638_v24 = vpop.eup %637  ;;  %489 = vst [vmem:[%s848_s5 + $0x10] sm:$0xff] %v636_v21  ;;  %657 = vrcp.f32 %v460_v18  ;;  %v453_v25 = vmul.f32 1.442695, %v422_v20 }
 0x1db   :  { %v640_v26 = vpop.eup %639  ;;  %487 = vst [vmem:[%s848_s5] sm:$0xff] %v638_v24  ;;  %659 = vpow2.f32 %v451_v19  ;;  %v449_v7 = vmul.f32 1.442695, %v420_v23 }
 0x1dc   :  { %v642_v27 = vpop.eup %641  ;;  %490 = vst [vmem:[%s848_s5 + $0x18] sm:$0xff] %v640_v26  ;;  %661 = vpow2.f32 %v447_v22 }
 0x1dd   :  { %v644_v28 = vpop.eup %643  ;;  %488 = vst [vmem:[%s848_s5 + $0x8] sm:$0xff] %v642_v27  ;;  %663 = vpow2.f32 %v453_v25 }
 0x1de   :  { %v646_v29 = vpop.eup %645  ;;  %v465_v30 = vadd.f32 1.0, %v644_v28  ;;  %665 = vpow2.f32 %v449_v7 }
 0x1df   :  { %v648_v31 = vpop.eup %647  ;;  %v463_v32 = vadd.f32 1.0, %v646_v29 }
 0x1e0   :  { %v650_v33 = vpop.eup %649  ;;  %667 = vrcp.f32 %v465_v30  ;;  %v466_v34 = vadd.f32 1.0, %v648_v31 }
 0x1e1   :  { %v652_v35 = vpop.eup %651  ;;  %669 = vrcp.f32 %v463_v32  ;;  %v464_v36 = vadd.f32 1.0, %v650_v33 }
 0x1e2   :  { %v654_v37 = vpop.eup %653  ;;  %493 = vst [vmem:[%s848_s5 + $0x30] sm:$0xff] %v652_v35  ;;  %671 = vrcp.f32 %v466_v34 }
 0x1e3   :  { %v656_v38 = vpop.eup %655  ;;  %491 = vst [vmem:[%s848_s5 + $0x20] sm:$0xff] %v654_v37  ;;  %673 = vrcp.f32 %v464_v36 }
 0x1e4   :  { %v658_v39 = vpop.eup %657  ;;  %494 = vst [vmem:[%s848_s5 + $0x38] sm:$0xff] %v656_v38 }
 0x1e5   :  { %v660_v40 = vpop.eup %659  ;;  %492 = vst [vmem:[%s848_s5 + $0x28] sm:$0xff] %v658_v39 }
 0x1e6   :  { %v662_v41 = vpop.eup %661  ;;  %v469_v42 = vadd.f32 1.0, %v660_v40 }
 0x1e7   :  { %v664_v43 = vpop.eup %663  ;;  %v467_v44 = vadd.f32 1.0, %v662_v41 }
 0x1e8   :  { %v666_v45 = vpop.eup %665  ;;  %675 = vrcp.f32 %v469_v42  ;;  %v470_v46 = vadd.f32 1.0, %v664_v43 }
 0x1e9   :  { %677 = vrcp.f32 %v467_v44  ;;  %v468_v47 = vadd.f32 1.0, %v666_v45 }
 0x1ea   :  { %v668_v48 = vpop.eup %667  ;;  %679 = vrcp.f32 %v470_v46 }
 0x1eb   :  { %v670_v49 = vpop.eup %669  ;;  %497 = vst [vmem:[%s848_s5 + $0x50] sm:$0xff] %v668_v48  ;;  %681 = vrcp.f32 %v468_v47 }
 0x1ec   :  { %v672_v50 = vpop.eup %671  ;;  %495 = vst [vmem:[%s848_s5 + $0x40] sm:$0xff] %v670_v49 }
 0x1ed   :  { %v674_v51 = vpop.eup %673  ;;  %498 = vst [vmem:[%s848_s5 + $0x58] sm:$0xff] %v672_v50 }
 0x1ee   :  { %496 = vst [vmem:[%s848_s5 + $0x48] sm:$0xff] %v674_v51 }
 0x1f2   :  { %v676_v52 = vpop.eup %675 }
 0x1f3   :  { %v678_v53 = vpop.eup %677  ;;  %501 = vst [vmem:[%s848_s5 + $0x70] sm:$0xff] %v676_v52 }
 0x1f4   :  { %v680_v54 = vpop.eup %679  ;;  %499 = vst [vmem:[%s848_s5 + $0x60] sm:$0xff] %v678_v53 }
 0x1f5   :  { %v682_v55 = vpop.eup %681  ;;  %502 = vst [vmem:[%s848_s5 + $0x78] sm:$0xff] %v680_v54 }
 0x1f6   :  { %500 = vst [vmem:[%s848_s5 + $0x68] sm:$0xff] %v682_v55 }

// kernel: gatenet_forward.1
= control target key start
LH: loop header
LB: loop body
LE: loop exit
PB: predicated region body
PF: predicated region fallthrough
CT: control target
= control target key end

     0   :  { %vm100_vm0 = vcmask 261120   ;;  %vm285_vm1 = vcmask 523264   ;;  %s843_s1 = inlined_call_operand.vmem [shape: bf16[32,64], index: 1, kind: input, shape index: {}]   ;;  %s844_s0 = inlined_call_operand.vmem [shape: bf16[128,32], index: 0, kind: input, shape index: {}]   ;;  %s845_s3 = inlined_call_operand.vmem [shape: bf16[64,128], index: 3, kind: input, shape index: {}]   ;;  %s846_s2 = inlined_call_operand.vmem [shape: f32[1,64], index: 2, kind: input, shape index: {}]   ;;  %s847_s4 = inlined_call_operand.vmem [shape: f32[1,128], index: 4, kind: input, shape index: {}]   ;;  %s848_s5 = inlined_call_operand.vmem [shape: f32[128,128], index: 5, kind: output, shape index: {}]  }
   0x1   :  { %v605_v0 = vld [vmem:[%s843_s1] sm:$0xff]   ;;  %v606_v1 = vld [vmem:[%s843_s1 + $0x8] sm:$0xff]   ;;  %v609_v4 = vld [vmem:[%s844_s0 + $0x10] sm:$0xff]  }
   0x2   :  { %561 = vmatprep.subr.bf16.mxu0 %v605_v0  ;;  %v607_v2 = vld [vmem:[%s844_s0] sm:$0xff]   ;;  %v608_v3 = vld [vmem:[%s844_s0 + $0x8] sm:$0xff]   ;;  %v610_v7 = vld [vmem:[%s844_s0 + $0x18] sm:$0xff]  }
   0x3   :  { %562 = vmatpush3.bf16.msra.mxu0 %v605_v0  ;;  %565 = vmatprep.mubr.msk.bf16.mxu0 %vm100_vm0, %v607_v2  ;;  %v615_v5 = vld [vmem:[%s845_s3] sm:$0xff]   ;;  %v616_v6 = vld [vmem:[%s845_s3 + $0x8] sm:$0xff]   ;;  %v613_v10 = vld [vmem:[%s844_s0 + $0x30] sm:$0xff]  }
   0x4   :  { %563 = vmatprep.subr.bf16.mxu0 %v606_v1  ;;  %581 = vmatprep.subr.bf16.mxu1 %v615_v5  ;;  %v611_v8 = vld [vmem:[%s844_s0 + $0x20] sm:$0xff]   ;;  %v612_v9 = vld [vmem:[%s844_s0 + $0x28] sm:$0xff]   ;;  %v614_v11 = vld [vmem:[%s844_s0 + $0x38] sm:$0xff]  }
   0x5   :  { %582 = vmatpush3.bf16.msra.mxu1 %v615_v5  ;;  %v617_v12 = vld [vmem:[%s845_s3 + $0x10] sm:$0xff]   ;;  %v618_v13 = vld [vmem:[%s845_s3 + $0x18] sm:$0xff]   ;;  %v507_v14 = vld [vmem:[%s846_s2] ss:$0 sm:$0xff] }
   0x6   :  { %583 = vmatprep.subr.bf16.mxu1 %v616_v6 }
   0x7   :  { %564 = vmatpush3.bf16.msra.mxu0 %v606_v1 }
   0x9   :  { %584 = vmatpush3.bf16.msra.mxu1 %v616_v6 }
   0xa   :  { %566 = vmatmul.mubr.msk.bf16.vlgmr.msra.gmra.mrb[0].mxu0 %vm100_vm0, %v608_v3  ;;  %585 = vmatprep.subr.bf16.mxu1 %v617_v12 }
   0xb   :  { %569 = vmatprep.mubr.msk.bf16.mxu0 %vm100_vm0, %v609_v4 }
   0xd   :  { %586 = vmatpush3.bf16.msra.mxu1 %v617_v12 }
   0xe   :  { %587 = vmatprep.subr.bf16.mxu1 %v618_v13 }
  0x11   :  { %588 = vmatpush3.bf16.msra.mxu1 %v618_v13 }
  0x12   :  { %570 = vmatmul.mubr.msk.bf16.gmra.mrb[4].mxu0 %vm100_vm0, %v610_v7  ;;  %v777_v7 = vld [vmem:[%s847_s4] ss:$0 sm:$0xff] }
  0x13   :  { %573 = vmatprep.mubr.msk.bf16.mxu0 %vm100_vm0, %v611_v8 }
  0x1a   :  { %574 = vmatmul.mubr.msk.bf16.gmra.mrb[8].mxu0 %vm100_vm0, %v612_v9 }
  0x1b   :  { %577 = vmatprep.mubr.msk.bf16.mxu0 %vm100_vm0, %v613_v10 }
  0x22   :  { %578 = vmatmul.mubr.msk.bf16.gmra.mrb[12].mxu0 %vm100_vm0, %v614_v11 }
  0xdd   :  { %v567_v15 = vpop.f32.mrb[0].mxu0 }
  0xde   :  { %v168_v16 = vadd.f32 %v567_v15, %v507_v14  ;;  %v159_v17 = vpop.f32.mrb[1].mxu0 }
  0xdf   :  { %v160_v18 = vadd.f32 %v507_v14, %v159_v17  ;;  %v568_v19 = vpop.f32.mrb[2].mxu0 }
  0xe0   :  { %v171_v20 = vadd.f32 %v568_v19, %v507_v14  ;;  %v162_v21 = vpop.f32.mrb[3].mxu0  ;;  %v224_v23 = vmax.f32 %v168_v16, 0.0 }
  0xe1   :  { %v163_v22 = vadd.f32 %v507_v14, %v162_v21  ;;  %v222_v25 = vmax.f32 %v160_v18, 0.0 }
  0xe2   :  { %v225_v24 = vmax.f32 %v171_v20, 0.0 }
  0xe3   :  { %v223_v26 = vmax.f32 %v163_v22, 0.0 }
  0xe4   :  { %v239_v27 = vpack.c.bf16 %v225_v24, %v224_v23 }
  0xe5   :  { %v571_v28 = vpop.f32.mrb[4].mxu0  ;;  %v238_v29 = vpack.c.bf16 %v223_v26, %v222_v25 }
  0xe6   :  { %v184_v30 = vadd.f32 %v571_v28, %v507_v14  ;;  %v175_v31 = vpop.f32.mrb[5].mxu0 }
  0xe7   :  { %v176_v32 = vadd.f32 %v507_v14, %v175_v31  ;;  %v572_v33 = vpop.f32.mrb[6].mxu0  ;;  %589 = vmatprep.mubr.msk.bf16.mxu1 %vm285_vm1, %v238_v29 }
  0xe8   :  { %v187_v34 = vadd.f32 %v572_v33, %v507_v14  ;;  %v178_v35 = vpop.f32.mrb[7].mxu0  ;;  %590 = vmatmul.mubr.msk.bf16.vlgmr.msra.gmra.mrb[0].mxu1 %vm285_vm1, %v239_v27  ;;  %v228_v37 = vmax.f32 %v184_v30, 0.0 }
  0xe9   :  { %v179_v36 = vadd.f32 %v507_v14, %v178_v35  ;;  %v226_v39 = vmax.f32 %v176_v32, 0.0 }
  0xea   :  { %v229_v38 = vmax.f32 %v187_v34, 0.0 }
  0xeb   :  { %v227_v40 = vmax.f32 %v179_v36, 0.0 }
  0xec   :  { %v241_v41 = vpack.c.bf16 %v229_v38, %v228_v37 }
  0xed   :  { %v240_v42 = vpack.c.bf16 %v227_v40, %v226_v39  ;;  %v575_v43 = vpop.f32.mrb[8].mxu0 }
  0xee   :  { %v200_v44 = vadd.f32 %v575_v43, %v507_v14  ;;  %v191_v45 = vpop.f32.mrb[9].mxu0 }
  0xef   :  { %v192_v46 = vadd.f32 %v507_v14, %v191_v45  ;;  %v576_v47 = vpop.f32.mrb[10].mxu0  ;;  %593 = vmatprep.mubr.msk.bf16.mxu1 %vm285_vm1, %v240_v42 }
  0xf0   :  { %v203_v48 = vadd.f32 %v576_v47, %v507_v14  ;;  %v194_v49 = vpop.f32.mrb[11].mxu0  ;;  %594 = vmatmul.mubr.msk.bf16.gmra.mrb[4].mxu1 %vm285_vm1, %v241_v41  ;;  %v232_v51 = vmax.f32 %v200_v44, 0.0 }
  0xf1   :  { %v195_v50 = vadd.f32 %v507_v14, %v194_v49  ;;  %v230_v53 = vmax.f32 %v192_v46, 0.0 }
  0xf2   :  { %v233_v52 = vmax.f32 %v203_v48, 0.0 }
  0xf3   :  { %v231_v54 = vmax.f32 %v195_v50, 0.0 }
  0xf4   :  { %v243_v55 = vpack.c.bf16 %v233_v52, %v232_v51 }
  0xf5   :  { %v242_v56 = vpack.c.bf16 %v231_v54, %v230_v53  ;;  %v579_v57 = vpop.f32.mrb[12].mxu0 }
  0xf6   :  { %v216_v58 = vadd.f32 %v579_v57, %v507_v14  ;;  %v207_v59 = vpop.f32.mrb[13].mxu0 }
  0xf7   :  { %v208_v60 = vadd.f32 %v507_v14, %v207_v59  ;;  %v580_v61 = vpop.f32.mrb[14].mxu0  ;;  %597 = vmatprep.mubr.msk.bf16.mxu1 %vm285_vm1, %v242_v56 }
  0xf8   :  { %v219_v62 = vadd.f32 %v580_v61, %v507_v14  ;;  %v210_v63 = vpop.f32.mrb[15].mxu0  ;;  %598 = vmatmul.mubr.msk.bf16.gmra.mrb[8].mxu1 %vm285_vm1, %v243_v55  ;;  %v236_v1 = vmax.f32 %v216_v58, 0.0 }
  0xf9   :  { %v211_v0 = vadd.f32 %v507_v14, %v210_v63  ;;  %v234_v3 = vmax.f32 %v208_v60, 0.0 }
  0xfa   :  { %v237_v2 = vmax.f32 %v219_v62, 0.0 }
  0xfb   :  { %v235_v4 = vmax.f32 %v211_v0, 0.0 }
  0xfc   :  { %v245_v5 = vpack.c.bf16 %v237_v2, %v236_v1 }
  0xfd   :  { %v244_v6 = vpack.c.bf16 %v235_v4, %v234_v3 }
  0xff   :  { %601 = vmatprep.mubr.msk.bf16.mxu1 %vm285_vm1, %v244_v6 }
 0x100   :  { %602 = vmatmul.mubr.msk.bf16.gmra.mrb[12].mxu1 %vm285_vm1, %v245_v5 }
 0x1bb   :  { %v591_v8 = vpop.f32.mrb[0].mxu1 }
 0x1bc   :  { %v353_v9 = vadd.f32 %v591_v8, %v777_v7  ;;  %v344_v10 = vpop.f32.mrb[1].mxu1 }
 0x1bd   :  { %v345_v11 = vadd.f32 %v777_v7, %v344_v10  ;;  %v592_v12 = vpop.f32.mrb[2].mxu1 }
 0x1be   :  { %v409_v13 = vsub.f32 0.0, %v353_v9  ;;  %v356_v14 = vadd.f32 %v592_v12, %v777_v7  ;;  %v347_v15 = vpop.f32.mrb[3].mxu1 }
 0x1bf   :  { %v407_v16 = vsub.f32 0.0, %v345_v11  ;;  %v348_v17 = vadd.f32 %v777_v7, %v347_v15 }
 0x1c0   :  { %v427_v18 = vmul.f32 1.442695, %v409_v13  ;;  %v410_v19 = vsub.f32 0.0, %v356_v14 }
 0x1c1   :  { %v423_v20 = vmul.f32 1.442695, %v407_v16  ;;  %v408_v21 = vsub.f32 0.0, %v348_v17 }
 0x1c2   :  { %619 = vpow2.f32 %v427_v18  ;;  %v429_v22 = vmul.f32 1.442695, %v410_v19 }
 0x1c3   :  { %621 = vpow2.f32 %v423_v20  ;;  %v425_v23 = vmul.f32 1.442695, %v408_v21  ;;  %v595_v24 = vpop.f32.mrb[4].mxu1 }
 0x1c4   :  { %623 = vpow2.f32 %v429_v22  ;;  %v369_v25 = vadd.f32 %v595_v24, %v777_v7  ;;  %v360_v26 = vpop.f32.mrb[5].mxu1 }
 0x1c5   :  { %625 = vpow2.f32 %v425_v23  ;;  %v361_v27 = vadd.f32 %v777_v7, %v360_v26  ;;  %v596_v28 = vpop.f32.mrb[6].mxu1 }
 0x1c6   :  { %v413_v29 = vsub.f32 0.0, %v369_v25  ;;  %v372_v30 = vadd.f32 %v596_v28, %v777_v7  ;;  %v363_v31 = vpop.f32.mrb[7].mxu1 }
 0x1c7   :  { %v411_v32 = vsub.f32 0.0, %v361_v27  ;;  %v364_v33 = vadd.f32 %v777_v7, %v363_v31 }
 0x1c8   :  { %v435_v34 = vmul.f32 1.442695, %v413_v29  ;;  %v414_v35 = vsub.f32 0.0, %v372_v30 }
 0x1c9   :  { %v431_v36 = vmul.f32 1.442695, %v411_v32  ;;  %v412_v37 = vsub.f32 0.0, %v364_v33 }
 0x1ca   :  { %627 = vpow2.f32 %v435_v34  ;;  %v437_v38 = vmul.f32 1.442695, %v414_v35 }
 0x1cb   :  { %629 = vpow2.f32 %v431_v36  ;;  %v433_v39 = vmul.f32 1.442695, %v412_v37  ;;  %v599_v40 = vpop.f32.mrb[8].mxu1 }
 0x1cc   :  { %v620_v41 = vpop.eup %619  ;;  %631 = vpow2.f32 %v437_v38  ;;  %v385_v42 = vadd.f32 %v599_v40, %v777_v7  ;;  %v376_v43 = vpop.f32.mrb[9].mxu1 }
 0x1cd   :  { %v622_v44 = vpop.eup %621  ;;  %v457_v45 = vadd.f32 1.0, %v620_v41  ;;  %633 = vpow2.f32 %v433_v39  ;;  %v377_v46 = vadd.f32 %v777_v7, %v376_v43  ;;  %v600_v47 = vpop.f32.mrb[10].mxu1 }
 0x1ce   :  { %v624_v48 = vpop.eup %623  ;;  %v455_v49 = vadd.f32 1.0, %v622_v44  ;;  %v417_v50 = vsub.f32 0.0, %v385_v42  ;;  %v388_v51 = vadd.f32 %v600_v47, %v777_v7  ;;  %v379_v52 = vpop.f32.mrb[11].mxu1 }
 0x1cf   :  { %v626_v53 = vpop.eup %625  ;;  %635 = vrcp.f32 %v457_v45  ;;  %v458_v54 = vadd.f32 1.0, %v624_v48  ;;  %v415_v55 = vsub.f32 0.0, %v377_v46  ;;  %v380_v56 = vadd.f32 %v777_v7, %v379_v52 }
 0x1d0   :  { %637 = vrcp.f32 %v455_v49  ;;  %v456_v57 = vadd.f32 1.0, %v626_v53  ;;  %v443_v58 = vmul.f32 1.442695, %v417_v50  ;;  %v418_v59 = vsub.f32 0.0, %v388_v51 }
 0x1d1   :  { %639 = vrcp.f32 %v458_v54  ;;  %v439_v60 = vmul.f32 1.442695, %v415_v55  ;;  %v416_v61 = vsub.f32 0.0, %v380_v56 }
 0x1d2   :  { %641 = vrcp.f32 %v456_v57  ;;  %v445_v62 = vmul.f32 1.442695, %v418_v59 }
 0x1d3   :  { %643 = vpow2.f32 %v443_v58  ;;  %v441_v63 = vmul.f32 1.442695, %v416_v61  ;;  %v603_v0 = vpop.f32.mrb[12].mxu1 }
 0x1d4   :  { %v628_v1 = vpop.eup %627  ;;  %645 = vpow2.f32 %v439_v60  ;;  %v401_v2 = vadd.f32 %v603_v0, %v777_v7  ;;  %v392_v3 = vpop.f32.mrb[13].mxu1 }
 0x1d5   :  { %v630_v4 = vpop.eup %629  ;;  %v461_v5 = vadd.f32 1.0, %v628_v1  ;;  %647 = vpow2.f32 %v445_v62  ;;  %v393_v6 = vadd.f32 %v777_v7, %v392_v3  ;;  %v604_v8 = vpop.f32.mrb[14].mxu1 }
 0x1d6   :  { %v632_v9 = vpop.eup %631  ;;  %v459_v10 = vadd.f32 1.0, %v630_v4  ;;  %649 = vpow2.f32 %v441_v63  ;;  %v421_v11 = vsub.f32 0.0, %v401_v2  ;;  %v404_v12 = vadd.f32 %v604_v8, %v777_v7  ;;  %v395_v13 = vpop.f32.mrb[15].mxu1 }
 0x1d7   :  { %v634_v14 = vpop.eup %633  ;;  %651 = vrcp.f32 %v461_v5  ;;  %v462_v15 = vadd.f32 1.0, %v632_v9  ;;  %v419_v16 = vsub.f32 0.0, %v393_v6  ;;  %v396_v17 = vadd.f32 %v777_v7, %v395_v13 }
 0x1d8   :  { %653 = vrcp.f32 %v459_v10  ;;  %v460_v18 = vadd.f32 1.0, %v634_v14  ;;  %v451_v19 = vmul.f32 1.442695, %v421_v11  ;;  %v422_v20 = vsub.f32 0.0, %v404_v12 }
 0x1d9   :  { %v636_v21 = vpop.eup %635  ;;  %655 = vrcp.f32 %v462_v15  ;;  %v447_v22 = vmul.f32 1.442695, %v419_v16  ;;  %v420_v23 = vsub.f32 0.0, %v396_v17 }
 0x1da   :  { %v638_v24 = vpop.eup %637  ;;  %489 = vst [vmem:[%s848_s5 + $0x10] sm:$0xff] %v636_v21  ;;  %657 = vrcp.f32 %v460_v18  ;;  %v453_v25 = vmul.f32 1.442695, %v422_v20 }
 0x1db   :  { %v640_v26 = vpop.eup %639  ;;  %487 = vst [vmem:[%s848_s5] sm:$0xff] %v638_v24  ;;  %659 = vpow2.f32 %v451_v19  ;;  %v449_v7 = vmul.f32 1.442695, %v420_v23 }
 0x1dc   :  { %v642_v27 = vpop.eup %641  ;;  %490 = vst [vmem:[%s848_s5 + $0x18] sm:$0xff] %v640_v26  ;;  %661 = vpow2.f32 %v447_v22 }
 0x1dd   :  { %v644_v28 = vpop.eup %643  ;;  %488 = vst [vmem:[%s848_s5 + $0x8] sm:$0xff] %v642_v27  ;;  %663 = vpow2.f32 %v453_v25 }
 0x1de   :  { %v646_v29 = vpop.eup %645  ;;  %v465_v30 = vadd.f32 1.0, %v644_v28  ;;  %665 = vpow2.f32 %v449_v7 }
 0x1df   :  { %v648_v31 = vpop.eup %647  ;;  %v463_v32 = vadd.f32 1.0, %v646_v29 }
 0x1e0   :  { %v650_v33 = vpop.eup %649  ;;  %667 = vrcp.f32 %v465_v30  ;;  %v466_v34 = vadd.f32 1.0, %v648_v31 }
 0x1e1   :  { %v652_v35 = vpop.eup %651  ;;  %669 = vrcp.f32 %v463_v32  ;;  %v464_v36 = vadd.f32 1.0, %v650_v33 }
 0x1e2   :  { %v654_v37 = vpop.eup %653  ;;  %493 = vst [vmem:[%s848_s5 + $0x30] sm:$0xff] %v652_v35  ;;  %671 = vrcp.f32 %v466_v34 }
 0x1e3   :  { %v656_v38 = vpop.eup %655  ;;  %491 = vst [vmem:[%s848_s5 + $0x20] sm:$0xff] %v654_v37  ;;  %673 = vrcp.f32 %v464_v36 }
 0x1e4   :  { %v658_v39 = vpop.eup %657  ;;  %494 = vst [vmem:[%s848_s5 + $0x38] sm:$0xff] %v656_v38 }
 0x1e5   :  { %v660_v40 = vpop.eup %659  ;;  %492 = vst [vmem:[%s848_s5 + $0x28] sm:$0xff] %v658_v39 }
 0x1e6   :  { %v662_v41 = vpop.eup %661  ;;  %v469_v42 = vadd.f32 1.0, %v660_v40 }
 0x1e7   :  { %v664_v43 = vpop.eup %663  ;;  %v467_v44 = vadd.f32 1.0, %v662_v41 }
 0x1e8   :  { %v666_v45 = vpop.eup %665  ;;  %675 = vrcp.f32 %v469_v42  ;;  %v470_v46 = vadd.f32 1.0, %v664_v43 }
 0x1e9   :  { %677 = vrcp.f32 %v467_v44  ;;  %v468_v47 = vadd.f32 1.0, %v666_v45 }
 0x1ea   :  { %v668_v48 = vpop.eup %667  ;;  %679 = vrcp.f32 %v470_v46 }
 0x1eb   :  { %v670_v49 = vpop.eup %669  ;;  %497 = vst [vmem:[%s848_s5 + $0x50] sm:$0xff] %v668_v48  ;;  %681 = vrcp.f32 %v468_v47 }
 0x1ec   :  { %v672_v50 = vpop.eup %671  ;;  %495 = vst [vmem:[%s848_s5 + $0x40] sm:$0xff] %v670_v49 }
 0x1ed   :  { %v674_v51 = vpop.eup %673  ;;  %498 = vst [vmem:[%s848_s5 + $0x58] sm:$0xff] %v672_v50 }
 0x1ee   :  { %496 = vst [vmem:[%s848_s5 + $0x48] sm:$0xff] %v674_v51 }
 0x1f2   :  { %v676_v52 = vpop.eup %675 }
 0x1f3   :  { %v678_v53 = vpop.eup %677  ;;  %501 = vst [vmem:[%s848_s5 + $0x70] sm:$0xff] %v676_v52 }
 0x1f4   :  { %v680_v54 = vpop.eup %679  ;;  %499 = vst [vmem:[%s848_s5 + $0x60] sm:$0xff] %v678_v53 }
 0x1f5   :  { %v682_v55 = vpop.eup %681  ;;  %502 = vst [vmem:[%s848_s5 + $0x78] sm:$0xff] %v680_v54 }
 0x1f6   :  { %500 = vst [vmem:[%s848_s5 + $0x68] sm:$0xff] %v682_v55 }

</bundles_post_ra>
